<compile_context>
chip_gen: v5e
topology: v5e:2x2
jax: 0.10.0
libtpu: 0.0.40
codegen_flags: <defaults>
</compile_context>

<pallas_src>
import functools

import jax
import jax.numpy as jnp
import numpy as np
from jax.experimental import pallas as pl
from jax.experimental.pallas import tpu as pltpu


def _pool_kernel(x_ref, mean_ref, acc_ref, *, inv_hw, t_hw, hw, mask_tail):
    """Global-average-pool pass.

    x_ref   : (t_c, t_hw)  one HW tile of one (batch, channel-tile)
    mean_ref: (t_c, 1)     f32 mean, written once on the last HW step
    acc_ref : (t_c, 128)   f32 lane-dense partial sums (VALU adds only per step)
    """
    j = pl.program_id(2)

    @pl.when(j == 0)
    def _():
        acc_ref[...] = jnp.zeros_like(acc_ref)

    xf = x_ref[...].astype(jnp.float32)
    if mask_tail:
        # Last HW block is ragged: zero the out-of-bounds lanes (their values
        # are unspecified padding).
        col = j * t_hw + jax.lax.broadcasted_iota(jnp.int32, xf.shape, 1)
        xf = jnp.where(col < hw, xf, 0.0)

    # Fold the tile into the lane-dense accumulator with a pairwise (log-depth)
    # tree of VALU adds over 128-lane columns; the one cross-lane XLU reduce
    # happens only in the finalize step below.
    cols = [xf[:, k * 128:(k + 1) * 128] for k in range(t_hw // 128)]
    while len(cols) > 1:
        nxt = [a + b for a, b in zip(cols[0::2], cols[1::2])]
        if len(cols) % 2:
            nxt.append(cols[-1])
        cols = nxt
    acc_ref[...] += cols[0]

    @pl.when(j == pl.num_programs(2) - 1)
    def _():
        mean_ref[...] = jnp.sum(acc_ref[...], axis=-1, keepdims=True) * inv_hw


def _scale_kernel(x_ref, gate_ref, o_ref):
    # x_ref: (t_c, t_hw)   gate_ref: (t_c, 1) in x's dtype   o_ref: (t_c, t_hw)
    o_ref[...] = (x_ref[...] * gate_ref[...]).astype(o_ref.dtype)


def _choose_tiles(c, hw, itemsize):
    """Pick (t_c, t_hw): ~1-4 MiB lane-dense blocks, VMEM-safe on v7x (64 MiB)."""
    hw_pad = -(-hw // 128) * 128
    target_bytes = 2 << 20      # amortize ~0.35 us per grid step
    max_block_bytes = 4 << 20   # keep ~4-6 double-buffered blocks well under v7x VMEM

    raw_lanes = (target_bytes // max(c * itemsize, 1)) // 128 * 128
    lanes = max(512, min(32768, raw_lanes))   # 32768 cap bounds unrolled code size
    t_hw = int(min(hw_pad, lanes))            # always a multiple of 128

    t_c = c
    if c % 8 == 0 and c * t_hw * itemsize > max_block_bytes:
        best = 8
        d = 8
        while d <= c:
            if c % d == 0 and d * t_hw * itemsize <= max_block_bytes:
                best = d
            d += 8
        t_c = best
    return t_c, t_hw


@functools.partial(jax.jit, static_argnames=("k_size",))
def eca_forward(x, conv_weight, k_size=3):
    """x: (b, c, h, w) NCHW (f32 or bf16). conv_weight: (1, 1, k) like PyTorch Conv1d."""
    b, c, h, w = x.shape
    hw = h * w
    pad = (k_size - 1) // 2

    # Free metadata reshape: flatten spatial so HW sits on the lane axis.
    # No wrapper-side jnp.pad / slice: ragged last HW tiles are handled
    # in-kernel, so HBM traffic stays at 2 reads + 1 write of x.
    x3 = x.reshape(b, c, hw)

    itemsize = jnp.dtype(x.dtype).itemsize
    t_c, t_hw = _choose_tiles(c, hw, itemsize)
    n_c = pl.cdiv(c, t_c)
    n_hw = pl.cdiv(hw, t_hw)
    mask_tail = (hw % t_hw) != 0

    block_bytes = t_c * t_hw * itemsize
    # ~4 double-buffered blocks in pass 2 plus headroom, never above 48 MiB so
    # the same tiling compiles with pipelining slack on v7x (64 MiB VMEM/TC).
    vmem_limit = int(min(48 << 20, max(8 << 20, 6 * block_bytes)))

    # ---------------- Pass 1: global average pool (Pallas) ----------------
    pooled = pl.pallas_call(
        functools.partial(_pool_kernel, inv_hw=1.0 / hw, t_hw=t_hw, hw=hw,
                          mask_tail=mask_tail),
        out_shape=jax.ShapeDtypeStruct((b, c, 1), jnp.float32),
        grid=(b, n_c, n_hw),
        in_specs=[pl.BlockSpec((None, t_c, t_hw), lambda i, ci, j: (i, ci, j))],
        out_specs=pl.BlockSpec((None, t_c, 1), lambda i, ci, j: (i, ci, 0)),
        scratch_shapes=[pltpu.VMEM((t_c, 128), jnp.float32)],
        compiler_params=pltpu.CompilerParams(
            dimension_semantics=("parallel", "parallel", "arbitrary"),
            vmem_limit_bytes=vmem_limit),
    )(x3)                                                     # (b, c, 1) f32 means

    # --- Gate: Conv1d(1,1,k, bias=False) over channels + sigmoid (tiny, XLA) ---
    # O(b*c*k) work; keeping it in XLA avoids any (C,C) band / MXU cost.
    w1d = conv_weight.reshape(-1).astype(jnp.float32)         # (k,)
    p2 = pooled[..., 0]                                       # (b, c)
    pp = jnp.pad(p2, ((0, 0), (pad, pad)))
    conv = sum(w1d[t] * pp[:, t:t + c] for t in range(k_size))
    gate = jax.nn.sigmoid(conv).astype(x.dtype).reshape(b, c, 1)

    # ------------- Pass 2: broadcast multiply x * gate (Pallas) -------------
    out3 = pl.pallas_call(
        _scale_kernel,
        out_shape=jax.ShapeDtypeStruct((b, c, hw), x.dtype),
        grid=(b, n_c, n_hw),
        in_specs=[pl.BlockSpec((None, t_c, t_hw), lambda i, ci, j: (i, ci, j)),
                  pl.BlockSpec((None, t_c, 1), lambda i, ci, j: (i, ci, 0))],
        out_specs=pl.BlockSpec((None, t_c, t_hw), lambda i, ci, j: (i, ci, j)),
        compiler_params=pltpu.CompilerParams(
            dimension_semantics=("parallel", "parallel", "parallel"),
            vmem_limit_bytes=vmem_limit),
    )(x3, gate)

    return out3.reshape(b, c, h, w)


def _ref_eca(x, conv_weight, k_size=3):
    """Pure-JAX reference matching the PyTorch module."""
    b, c, h, w = x.shape
    pad = (k_size - 1) // 2
    w1d = conv_weight.reshape(-1)
    pooled = x.mean(axis=(2, 3))                              # (b, c)
    pp = jnp.pad(pooled, ((0, 0), (pad, pad)))
    conv = sum(w1d[t] * pp[:, t:t + c] for t in range(k_size))
    gate = jax.nn.sigmoid(conv)
    return x * gate[:, :, None, None]


if __name__ == "__main__":
    key = jax.random.PRNGKey(0)
    kx, kw = jax.random.split(key)

    k_size = 3
    bound = 1.0 / np.sqrt(k_size)
    # Deterministic synthetic Conv1d(1, 1, k, bias=False) weight, PyTorch shape (1, 1, k).
    conv_weight = jax.random.uniform(kw, (1, 1, k_size), dtype=jnp.float32,
                                     minval=-bound, maxval=bound)

    def check(x, atol, rtol):
        out = jax.block_until_ready(eca_forward(x, conv_weight, k_size=k_size))
        ref = jax.block_until_ready(
            _ref_eca(x.astype(jnp.float32), conv_weight, k_size=k_size))
        np.testing.assert_allclose(np.asarray(out.astype(jnp.float32)),
                                   np.asarray(ref), atol=atol, rtol=rtol)

    # (1) Main config: 128-aligned flattened spatial, single HW block per (b, c)-tile.
    x = jax.random.normal(kx, (2, 32, 16, 16), dtype=jnp.float32)
    check(x, 1e-5, 1e-5)

    # (2) Non-128-aligned spatial (7x7 = 49): ragged tile handled in-kernel
    #     (no wrapper pad / slice HBM passes).
    check(jax.random.normal(jax.random.PRNGKey(1), (2, 16, 7, 7), jnp.float32),
          1e-5, 1e-5)

    # (3) bf16 I/O (halves HBM traffic); pooling still accumulates in f32.
    check(x.astype(jnp.bfloat16), 3e-2, 3e-2)

    # (4) Multi-step HW reduction with a ragged last tile (hw=1369, t_hw=1024).
    check(jax.random.normal(jax.random.PRNGKey(2), (1, 512, 37, 37), jnp.float32),
          1e-5, 1e-5)

    # (5) Large-channel layer: exercises the parallel C-tiling axis (t_c < c).
    check(jax.random.normal(jax.random.PRNGKey(3), (1, 4096, 32, 32), jnp.float32),
          1e-5, 1e-5)

    print("KERNEL_OK")
</pallas_src>

<mosaic_0001>
module attributes {stable_mosaic.version = 11 : i64} {
  func.func @_pool_kernel(%arg0: i32, %arg1: i32, %arg2: i32, %arg3: memref<1x32x256xf32, #tpu.memory_space<vmem>>, %arg4: memref<1x32x1xf32, #tpu.memory_space<vmem>>, %arg5: memref<32x128xf32, #tpu.memory_space<vmem>>) attributes {dimension_semantics = [#tpu.dimension_semantics<parallel>, #tpu.dimension_semantics<parallel>, #tpu.dimension_semantics<arbitrary>], iteration_bounds = array<i64: 2, 1, 1>, scalar_prefetch = 0 : i64, scratch_operands = 1 : i64, tpu.core_type = #tpu.core_type<tc>, window_params = [{transform_indices = @transform_0, window_bounds = array<i64: 1, 32, 256>}, {transform_indices = @transform_1, window_bounds = array<i64: 1, 32, 1>}]} {
    %c0_i32 = arith.constant 0 : i32
    %0 = arith.cmpi eq, %arg2, %c0_i32 : i32
    %1 = arith.extui %0 : i1 to i32
    %c0_i32_0 = arith.constant 0 : i32
    %2 = arith.cmpi ne, %1, %c0_i32_0 : i32
    scf.if %2 {
      %cst = arith.constant 0.000000e+00 : f32
      %14 = vector.broadcast %cst : f32 to vector<32x128xf32>
      %c0_9 = arith.constant 0 : index
      %c0_10 = arith.constant 0 : index
      %15 = vector.load %arg5[%c0_9, %c0_10] : memref<32x128xf32, #tpu.memory_space<vmem>>, vector<32x128xf32>
      tpu.vector_store %arg5[%c0_9, %c0_10], %14 {strides = array<i32>} : memref<32x128xf32, #tpu.memory_space<vmem>>, vector<32x128xf32>,
    } else {
    }
    %c0 = arith.constant 0 : index
    %c0_1 = arith.constant 0 : index
    %c0_2 = arith.constant 0 : index
    %3 = vector.load %arg3[%c0, %c0_1, %c0_2] : memref<1x32x256xf32, #tpu.memory_space<vmem>>, vector<1x32x256xf32>
    %4 = vector.shape_cast %3 : vector<1x32x256xf32> to vector<32x256xf32>
    %5 = vector.extract_strided_slice %4 {offsets = [0, 0], sizes = [32, 128], strides = [1, 1]} : vector<32x256xf32> to vector<32x128xf32>
    %6 = vector.extract_strided_slice %4 {offsets = [0, 128], sizes = [32, 128], strides = [1, 1]} : vector<32x256xf32> to vector<32x128xf32>
    %7 = arith.addf %5, %6 : vector<32x128xf32>
    %c0_3 = arith.constant 0 : index
    %c0_4 = arith.constant 0 : index
    %8 = vector.load %arg5[%c0_3, %c0_4] : memref<32x128xf32, #tpu.memory_space<vmem>>, vector<32x128xf32>
    %9 = arith.addf %8, %7 : vector<32x128xf32>
    %c0_5 = arith.constant 0 : index
    %c0_6 = arith.constant 0 : index
    %10 = vector.load %arg5[%c0_5, %c0_6] : memref<32x128xf32, #tpu.memory_space<vmem>>, vector<32x128xf32>
    tpu.vector_store %arg5[%c0_5, %c0_6], %9 {strides = array<i32>} : memref<32x128xf32, #tpu.memory_space<vmem>>, vector<32x128xf32>,
    %c0_i32_7 = arith.constant 0 : i32
    %11 = arith.cmpi eq, %arg2, %c0_i32_7 : i32
    %12 = arith.extui %11 : i1 to i32
    %c0_i32_8 = arith.constant 0 : i32
    %13 = arith.cmpi ne, %12, %c0_i32_8 : i32
    scf.if %13 {
      %c0_9 = arith.constant 0 : index
      %c0_10 = arith.constant 0 : index
      %14 = vector.load %arg5[%c0_9, %c0_10] : memref<32x128xf32, #tpu.memory_space<vmem>>, vector<32x128xf32>
      %cst = arith.constant dense<0.000000e+00> : vector<32xf32>
      %15 = vector.multi_reduction <add>, %14, %cst [1] : vector<32x128xf32> to vector<32xf32>
      %16 = vector.shape_cast %15 : vector<32xf32> to vector<32x1xf32>
      %cst_11 = arith.constant 3.906250e-03 : f32
      %17 = vector.broadcast %cst_11 : f32 to vector<32x1xf32>
      %18 = arith.mulf %16, %17 : vector<32x1xf32>
      %c0_12 = arith.constant 0 : index
      %c0_13 = arith.constant 0 : index
      %c0_14 = arith.constant 0 : index
      %19 = vector.load %arg4[%c0_12, %c0_13, %c0_14] : memref<1x32x1xf32, #tpu.memory_space<vmem>>, vector<1x32x1xf32>
      %20 = vector.shape_cast %19 : vector<1x32x1xf32> to vector<32x1xf32>
      %21 = vector.shape_cast %18 : vector<32x1xf32> to vector<1x32x1xf32>
      tpu.vector_store %arg4[%c0_12, %c0_13, %c0_14], %21 {strides = array<i32>} : memref<1x32x1xf32, #tpu.memory_space<vmem>>, vector<1x32x1xf32>,
    } else {
    }
    return
  }
  func.func @transform_0(%arg0: i32, %arg1: i32, %arg2: i32) -> (i32, i32, i32) {
    %c0_i32 = arith.constant 0 : i32
    return %arg0, %arg1, %arg2 : i32, i32, i32
  }
  func.func @transform_1(%arg0: i32, %arg1: i32, %arg2: i32) -> (i32, i32, i32) {
    %c0_i32 = arith.constant 0 : i32
    %c0_i32_0 = arith.constant 0 : i32
    return %arg0, %arg1, %c0_i32 : i32, i32, i32
  }
}

module attributes {stable_mosaic.version = 11 : i64} {
  func.func @_scale_kernel(%arg0: i32, %arg1: i32, %arg2: i32, %arg3: memref<1x32x256xf32, #tpu.memory_space<vmem>>, %arg4: memref<1x32x1xf32, #tpu.memory_space<vmem>>, %arg5: memref<1x32x256xf32, #tpu.memory_space<vmem>>) attributes {dimension_semantics = [#tpu.dimension_semantics<parallel>, #tpu.dimension_semantics<parallel>, #tpu.dimension_semantics<parallel>], iteration_bounds = array<i64: 2, 1, 1>, scalar_prefetch = 0 : i64, scratch_operands = 0 : i64, tpu.core_type = #tpu.core_type<tc>, window_params = [{transform_indices = @transform_0, window_bounds = array<i64: 1, 32, 256>}, {transform_indices = @transform_1, window_bounds = array<i64: 1, 32, 1>}, {transform_indices = @transform_2, window_bounds = array<i64: 1, 32, 256>}]} {
    %c0 = arith.constant 0 : index
    %c0_0 = arith.constant 0 : index
    %c0_1 = arith.constant 0 : index
    %0 = vector.load %arg3[%c0, %c0_0, %c0_1] : memref<1x32x256xf32, #tpu.memory_space<vmem>>, vector<1x32x256xf32>
    %1 = vector.shape_cast %0 : vector<1x32x256xf32> to vector<32x256xf32>
    %c0_2 = arith.constant 0 : index
    %c0_3 = arith.constant 0 : index
    %c0_4 = arith.constant 0 : index
    %2 = vector.load %arg4[%c0_2, %c0_3, %c0_4] : memref<1x32x1xf32, #tpu.memory_space<vmem>>, vector<1x32x1xf32>
    %3 = vector.shape_cast %2 : vector<1x32x1xf32> to vector<32x1xf32>
    %4 = vector.broadcast %3 : vector<32x1xf32> to vector<32x256xf32>
    %5 = arith.mulf %1, %4 : vector<32x256xf32>
    %c0_5 = arith.constant 0 : index
    %c0_6 = arith.constant 0 : index
    %c0_7 = arith.constant 0 : index
    %6 = vector.load %arg5[%c0_5, %c0_6, %c0_7] : memref<1x32x256xf32, #tpu.memory_space<vmem>>, vector<1x32x256xf32>
    %7 = vector.shape_cast %6 : vector<1x32x256xf32> to vector<32x256xf32>
    %8 = vector.shape_cast %5 : vector<32x256xf32> to vector<1x32x256xf32>
    tpu.vector_store %arg5[%c0_5, %c0_6, %c0_7], %8 {strides = array<i32>} : memref<1x32x256xf32, #tpu.memory_space<vmem>>, vector<1x32x256xf32>,
    return
  }
  func.func @transform_0(%arg0: i32, %arg1: i32, %arg2: i32) -> (i32, i32, i32) {
    %c0_i32 = arith.constant 0 : i32
    return %arg0, %arg1, %arg2 : i32, i32, i32
  }
  func.func @transform_1(%arg0: i32, %arg1: i32, %arg2: i32) -> (i32, i32, i32) {
    %c0_i32 = arith.constant 0 : i32
    %c0_i32_0 = arith.constant 0 : i32
    return %arg0, %arg1, %c0_i32 : i32, i32, i32
  }
  func.func @transform_2(%arg0: i32, %arg1: i32, %arg2: i32) -> (i32, i32, i32) {
    %c0_i32 = arith.constant 0 : i32
    return %arg0, %arg1, %arg2 : i32, i32, i32
  }
}

</mosaic_0001>

<bundles_post_ra>
// kernel: eca_forward.2
= control target key start
LH: loop header
LB: loop body
LE: loop exit
PB: predicated region body
PF: predicated region fallthrough
CT: control target
= control target key end

     0   :  { %s405_s6 = smov 0   ;;  %s407_s7 = smov 0   ;;  %s438_s0 = inlined_call_operand.vmem [shape: f32[2,32,256], index: 0, kind: input, shape index: {}]   ;;  %s439_s1 = inlined_call_operand.vmem [shape: f32[2,32,1], index: 1, kind: output, shape index: {}]  }
   0x1   :  { %s409_s8 = smov 0  }
   0x2 LB: > { %s30_s9 = sadd.s32 1, %s389_s7  ;;  %p338_p0 = scmp.ge.s32.totalorder %s393_s8, 1  ;;  %s393_s8 = sphi %s409_s8, %s11_s8   ;;  %s389_s7 = sphi %s407_s7, %s441_s7   ;;  %s385_s6 = sphi %s405_s6, %s440_s6  }
   0x3   : > { %p32_p1 = scmp.ge.s32.totalorder %s30_s9, 2  ;;  %p123_p2 = scmp.lt.s32.totalorder %s393_s8, 3 }
   0x5   : > { %s443_s9 = smov (%p32_p1, %s30_s9), 0  ;;  %p124_p3 = pnand %p338_p0, %p123_p2 }
   0x6   : > { %p158_p4 = scmp.lt.s32.totalorder (!%p124_p3), %s385_s6, 1 }
   0x7   : > { %127 = sbr.rel (%p124_p3) target bundleno = 146 (0x92), region = 24 }
   0xc   : > { %s445_s6 = smov (!%p158_p4, %s385_s6), 1  ;;  %vm233_vm0 = vcmask 7168  }
   0xd   : > { %s345_s10 = sshll.u32 %s445_s6, 6  ;;  %s346_s14 = sshll.u32 %s445_s6, 5 }
   0xe   : > { %s169_s13 = scalar_lea.vmem %s438_s0, %s345_s10  ;;  %s180_s17 = scalar_lea.vmem %s439_s1, %s346_s14 }
   0xf   : > { %v194_v0 = vld [vmem:[%s169_s13 + $0x20] sm:$0xff]  ;;  %v195_v1 = vld [vmem:[%s169_s13 + $0x28] sm:$0xff]  ;;  %v196_v6 = vld [vmem:[%s169_s13 + $0x30] sm:$0xff] }
  0x10   : > { %v190_v2 = vld [vmem:[%s169_s13] sm:$0xff]  ;;  %v200_v3 = vadd.f32 %v195_v1, %v194_v0  ;;  %v191_v4 = vld [vmem:[%s169_s13 + $0x8] sm:$0xff]  ;;  %v197_v7 = vld [vmem:[%s169_s13 + $0x38] sm:$0xff] }
  0x11   : > { %v198_v5 = vadd.f32 %v191_v4, %v190_v2  ;;  %v192_v8 = vld [vmem:[%s169_s13 + $0x10] sm:$0xff]  ;;  %v193_v9 = vld [vmem:[%s169_s13 + $0x18] sm:$0xff]  ;;  %v201_v10 = vadd.f32 %v197_v7, %v196_v6 }
  0x12   : > { %225 = vadd.xlane.f32.xlu1 %v200_v3  ;;  %v199_v11 = vadd.f32 %v193_v9, %v192_v8 }
  0x13   : > { %221 = vadd.xlane.f32.xlu0 %v198_v5 }
  0x1a   : > { %227 = vadd.xlane.f32.xlu1 %v201_v10 }
  0x1b   : > { %223 = vadd.xlane.f32.xlu0 %v199_v11 }
  0x85   : > { %v226_v12 = vpop.xlane.xlu1 %225 }
  0x86   : > { %v231_v13 = vmul.f32 0.00390625, %v226_v12  ;;  %v222_v14 = vpop.xlane.xlu0 %221 }
  0x87   : > { %v229_v15 = vmul.f32 0.00390625, %v222_v14 }
  0x88   : > { %236 = vst.msk [vmem:[%s180_s17 + $0x10] sm:$0xff] %vm233_vm0, %v231_v13 }
  0x89   : > { %234 = vst.msk [vmem:[%s180_s17] sm:$0xff] %vm233_vm0, %v229_v15 }
  0x8d   : > { %v228_v16 = vpop.xlane.xlu1 %227 }
  0x8e   : > { %v232_v17 = vmul.f32 0.00390625, %v228_v16  ;;  %v224_v18 = vpop.xlane.xlu0 %223 }
  0x8f   : > { %v230_v19 = vmul.f32 0.00390625, %v224_v18 }
  0x90   : > { %237 = vst.msk [vmem:[%s180_s17 + $0x18] sm:$0xff] %vm233_vm0, %v232_v17 }
  0x91   : > { %235 = vst.msk [vmem:[%s180_s17 + $0x8] sm:$0xff] %vm233_vm0, %v230_v19 }
  0x92 PF: > { %s11_s8 = sadd.s32 1, %s393_s8   ;;  %s440_s6 = smov %s389_s7 }
  0x93   : > { %p8_p5 = scmp.ge.s32.totalorder %s11_s8, 4   ;;  %s441_s7 = smov %s443_s9 }
  0x95   :  { %10 = sbr.rel (!%p8_p5) target bundleno = 2 (0x2), region = 62 }

// kernel: eca_forward.3
= control target key start
LH: loop header
LB: loop body
LE: loop exit
PB: predicated region body
PF: predicated region fallthrough
CT: control target
= control target key end

     0   :  { %s522_s9 = smov 0   ;;  %s524_s10 = smov 0   ;;  %s558_s0 = inlined_call_operand.vmem [shape: f32[2,32,256], index: 0, kind: input, shape index: {}]   ;;  %s559_s1 = inlined_call_operand.vmem [shape: f32[2,32,1], index: 1, kind: input, shape index: {}]   ;;  %s560_s2 = inlined_call_operand.vmem [shape: f32[2,32,256], index: 2, kind: output, shape index: {}]  }
   0x1   :  { %s526_s11 = smov 0  }
   0x2 LB: > { %s31_s12 = sadd.s32 1, %s500_s10  ;;  %p443_p0 = scmp.ge.s32.totalorder %s504_s11, 1  ;;  %s504_s11 = sphi %s526_s11, %s12_s11   ;;  %s500_s10 = sphi %s524_s10, %s562_s10   ;;  %s496_s9 = sphi %s522_s9, %s561_s9  }
   0x3   : > { %p33_p1 = scmp.ge.s32.totalorder %s31_s12, 2  ;;  %p167_p2 = scmp.lt.s32.totalorder %s504_s11, 3 }
   0x5   : > { %s564_s12 = smov (%p33_p1, %s31_s12), 0  ;;  %p168_p3 = pnand %p443_p0, %p167_p2 }
   0x6   : > { %p218_p4 = scmp.lt.s32.totalorder (!%p168_p3), %s496_s9, 1 }
   0x7   : > { %171 = sbr.rel (%p168_p3) target bundleno = 145 (0x91), region = 28 }
   0xc   : > { %v506_v0 = vmov 0   ;;  %s566_s9 = smov (!%p218_p4, %s496_s9), 1 }
   0xd   : > { %481 = vset.pattern.permute.xlu1 %v506_v0  ;;  %480 = vset.pattern.permute.xlu0 %v506_v0  ;;  %s453_s13 = sshll.u32 %s566_s9, 5  ;;  %s452_s17 = sshll.u32 %s566_s9, 6 }
   0xe   : > { %s240_s16 = scalar_lea.vmem %s559_s1, %s453_s13  ;;  %s229_s20 = scalar_lea.vmem %s558_s0, %s452_s17 }
   0xf   : > { %v268_v1 = vld [vmem:[%s240_s16 + $0x10] sm:$0xff]  ;;  %v266_v2 = vld [vmem:[%s240_s16] sm:$0xff]  ;;  %v269_v3 = vld [vmem:[%s240_s16 + $0x18] sm:$0xff]  ;;  %s255_s23 = scalar_lea.vmem %s560_s2, %s452_s17 }
  0x10   : > { %282 = vperm.xlu1 %481, %v268_v1   ;;  %272 = vperm.xlu0 %480, %v266_v2   ;;  %v267_v4 = vld [vmem:[%s240_s16 + $0x8] sm:$0xff]  ;;  %v262_v5 = vld [vmem:[%s229_s20 + $0x20] sm:$0xff]  ;;  %v264_v15 = vld [vmem:[%s229_s20 + $0x30] sm:$0xff] }
  0x11   : > { %v263_v6 = vld [vmem:[%s229_s20 + $0x28] sm:$0xff]  ;;  %v258_v7 = vld [vmem:[%s229_s20] sm:$0xff]  ;;  %v265_v16 = vld [vmem:[%s229_s20 + $0x38] sm:$0xff] }
  0x12   : > { %v259_v8 = vld [vmem:[%s229_s20 + $0x8] sm:$0xff]  ;;  %v260_v17 = vld [vmem:[%s229_s20 + $0x10] sm:$0xff]  ;;  %v261_v18 = vld [vmem:[%s229_s20 + $0x18] sm:$0xff] }
  0x18   : > { %287 = vperm.xlu1 %481, %v269_v3   ;;  %277 = vperm.xlu0 %480, %v267_v4  }
  0x82   : > { %v283_v9 = vpop.permute.xlu1 %282  ;;  %v273_v10 = vpop.permute.xlu0 %272 }
  0x83   : > { %v294_v11 = vmul.f32 %v283_v9, %v262_v5  ;;  %v295_v12 = vmul.f32 %v283_v9, %v263_v6  ;;  %v290_v13 = vmul.f32 %v273_v10, %v258_v7  ;;  %v291_v14 = vmul.f32 %v273_v10, %v259_v8 }
  0x85   : > { %302 = vst [vmem:[%s255_s23 + $0x20] sm:$0xff] %v294_v11 }
  0x86   : > { %303 = vst [vmem:[%s255_s23 + $0x28] sm:$0xff] %v295_v12 }
  0x87   : > { %298 = vst [vmem:[%s255_s23] sm:$0xff] %v290_v13 }
  0x88   : > { %299 = vst [vmem:[%s255_s23 + $0x8] sm:$0xff] %v291_v14 }
  0x8a   : > { %v288_v19 = vpop.permute.xlu1 %287  ;;  %v278_v20 = vpop.permute.xlu0 %277 }
  0x8b   : > { %v296_v21 = vmul.f32 %v288_v19, %v264_v15  ;;  %v297_v22 = vmul.f32 %v288_v19, %v265_v16  ;;  %v292_v23 = vmul.f32 %v278_v20, %v260_v17  ;;  %v293_v24 = vmul.f32 %v278_v20, %v261_v18 }
  0x8d   : > { %304 = vst [vmem:[%s255_s23 + $0x30] sm:$0xff] %v296_v21 }
  0x8e   : > { %305 = vst [vmem:[%s255_s23 + $0x38] sm:$0xff] %v297_v22 }
  0x8f   : > { %300 = vst [vmem:[%s255_s23 + $0x10] sm:$0xff] %v292_v23 }
  0x90   : > { %301 = vst [vmem:[%s255_s23 + $0x18] sm:$0xff] %v293_v24 }
  0x91 PF: > { %s12_s11 = sadd.s32 1, %s504_s11   ;;  %s561_s9 = smov %s500_s10 }
  0x92   : > { %p9_p5 = scmp.ge.s32.totalorder %s12_s11, 4   ;;  %s562_s10 = smov %s564_s12 }
  0x94   :  { %11 = sbr.rel (!%p9_p5) target bundleno = 2 (0x2), region = 61 }

</bundles_post_ra>
